<compile_context>
chip_gen: v7x
topology: tpu7x:2x2x1
jax: 0.10.0
libtpu: 0.0.40
codegen_flags: <defaults>
</compile_context>

<pallas_src>
import jax
import jax.numpy as jnp
from jax.experimental import pallas as pl
from jax.experimental.pallas import tpu as pltpu


def _round_up(x, m):
    return ((x + m - 1) // m) * m


def _vmem_limit_bytes():
    """Generation-aware scoped-VMEM limit (v7x: 64 MiB/TC, v5e/v6e: 128 MiB)."""
    cap = 64 * 1024 * 1024  # conservative fallback = v7x per-TC VMEM
    try:
        info = pltpu.get_tpu_info()
        cap = int(getattr(info, "vmem_capacity_bytes", cap)) or cap
    except Exception:
        pass
    return int(min(3 * cap // 4, 96 * 1024 * 1024))


def _pick_agg_tiles(n, f_pad, agg_itemsize, out_itemsize, vmem_limit,
                    tile_m=None, tile_k=None):
    """Pick (tile_m, tile_k) for the A @ H stage from the VMEM budget."""
    if tile_m is None:
        tile_m = 1024
    if tile_k is None:
        budget = int(vmem_limit * 0.8)
        tile_k = 512
        for cand in (4096, 2048, 1024, 512):
            need = (2 * tile_m * cand * agg_itemsize      # A, double-buffered
                    + 2 * cand * f_pad * agg_itemsize     # H, double-buffered
                    + 2 * tile_m * f_pad * out_itemsize)  # output block
            if need <= budget:
                tile_k = cand
                break
    # Clamp to the problem size, then defensively re-round so the (8, 128)
    # BlockSpec constraint always holds (also for user-supplied tiles).
    tile_m = min(tile_m, _round_up(n, 8))
    tile_k = min(tile_k, _round_up(n, 128))
    tile_m = _round_up(max(tile_m, 8), 8)
    tile_k = _round_up(max(tile_k, 128), 128)
    # v7x megacore: if all destination rows fit in one tile, split the row
    # axis so the "parallel" grid dim can shard across both TensorCores.
    if tile_m >= _round_up(n, 8) and tile_m > 512:
        tile_m = _round_up((tile_m + 1) // 2, 8)
    return tile_m, tile_k


# ---------------------------------------------------------------------------
# Kernel 1: node-wise linear layer  H = x @ W_t + b   (computed exactly once)
# ---------------------------------------------------------------------------
def _linear_kernel(x_ref, w_ref, b_ref, h_ref):
    h = jnp.dot(x_ref[...], w_ref[...], preferred_element_type=jnp.float32)
    h_ref[...] = (h + b_ref[...]).astype(h_ref.dtype)


# ---------------------------------------------------------------------------
# Kernel 2: weighted aggregation  out = A @ H
#   grid = (M tiles, K tiles); reduction axis last; output block resident
#   across K.  Two variants: f32 output accumulates directly into out_ref,
#   other dtypes use an f32 VMEM scratch accumulator.
# ---------------------------------------------------------------------------
def _agg_kernel_f32out(a_ref, h_ref, out_ref):
    @pl.when(pl.program_id(1) == 0)
    def _():
        out_ref[...] = jnp.zeros_like(out_ref)

    out_ref[...] += jnp.dot(a_ref[...], h_ref[...],
                            preferred_element_type=jnp.float32)


def _agg_kernel_scratch(a_ref, h_ref, out_ref, acc_ref):
    k = pl.program_id(1)

    @pl.when(k == 0)
    def _():
        acc_ref[...] = jnp.zeros_like(acc_ref)

    acc_ref[...] += jnp.dot(a_ref[...], h_ref[...],
                            preferred_element_type=jnp.float32)

    @pl.when(k == pl.num_programs(1) - 1)
    def _():
        out_ref[...] = acc_ref[...].astype(out_ref.dtype)


def gcn_conv_dgl(x, adj, weight, bias, *, tile_m=None, tile_k=None,
                 agg_dtype=None, vmem_limit_bytes=None):
    """out = adj @ (x @ weight.T + bias)   (GCNConv_dgl forward).

    x:      (N, F_in)   node features
    adj:    (N, N)      dense weighted adjacency, adj[dst, src] = edge weight
    weight: (F_out, F_in)  nn.Linear weight (PyTorch layout)
    bias:   (F_out,)
    agg_dtype: dtype for the aggregation operands A and H.  The aggregation is
        HBM-bandwidth-bound on A, so jnp.bfloat16 (f32 accumulation is kept)
        roughly halves HBM traffic and is the recommended setting for large
        graphs; the default (None -> x.dtype) keeps exact f32 semantics.
    """
    N, f_in = x.shape
    f_out = weight.shape[0]
    out_dtype = x.dtype
    agg_dtype = jnp.dtype(out_dtype if agg_dtype is None else agg_dtype)
    out_is_f32 = jnp.dtype(out_dtype) == jnp.dtype(jnp.float32)

    if vmem_limit_bytes is None:
        vmem_limit_bytes = _vmem_limit_bytes()
    vmem_limit_bytes = int(vmem_limit_bytes)

    # ---- tiling / padding so every block is (8,128)-aligned and lane-dense --
    f_pad = _round_up(f_out, 128)
    tile_m, tile_k = _pick_agg_tiles(
        N, f_pad, agg_dtype.itemsize, jnp.dtype(out_dtype).itemsize,
        vmem_limit_bytes, tile_m, tile_k)
    n_pad_m = _round_up(N, tile_m)          # destination-node (row) padding
    n_pad_k = _round_up(N, tile_k)          # source-node (col) padding

    # One-time parameter prep (in a real model do this at parameter load).
    if f_pad == f_out:
        w_t = weight.T.astype(x.dtype)
        b2 = bias.reshape(1, f_out).astype(x.dtype)
    else:
        w_t = jnp.zeros((f_in, f_pad), x.dtype).at[:, :f_out].set(weight.T)
        b2 = jnp.zeros((1, f_pad), x.dtype).at[:, :f_out].set(bias)

    # Pad only when needed -- no extra host-side pass over x / A for aligned N.
    x_p = x if n_pad_k == N else (
        jnp.zeros((n_pad_k, f_in), x.dtype).at[:N, :].set(x))
    if n_pad_m == N and n_pad_k == N:
        a_p = adj if adj.dtype == agg_dtype else adj.astype(agg_dtype)
    else:
        a_p = jnp.zeros((n_pad_m, n_pad_k), agg_dtype).at[:N, :N].set(
            adj.astype(agg_dtype))
    # TODO(synk): for genuinely block-sparse graphs, scalar-prefetch a
    # compacted list of nonzero (row_tile, col_tile) coordinates and use a
    # data-dependent index_map so all-zero A tiles are never DMA'd at all.

    # ---- stage 1: H = x @ W.T + b  (once, lane-dense padded F_out) ---------
    # Use one big row tile when x + H fit comfortably in VMEM, otherwise
    # tile_k-sized rows (which always divide n_pad_k).
    row_bytes = 2 * (f_in * jnp.dtype(x.dtype).itemsize
                     + f_pad * agg_dtype.itemsize)
    tile_h = n_pad_k if n_pad_k * row_bytes <= vmem_limit_bytes // 2 else tile_k

    h = pl.pallas_call(
        _linear_kernel,
        out_shape=jax.ShapeDtypeStruct((n_pad_k, f_pad), agg_dtype),
        grid_spec=pltpu.PrefetchScalarGridSpec(
            num_scalar_prefetch=0,
            grid=(n_pad_k // tile_h,),
            in_specs=[
                pl.BlockSpec((tile_h, f_in), lambda i: (i, 0)),
                pl.BlockSpec((f_in, f_pad), lambda i: (0, 0)),
                pl.BlockSpec((1, f_pad), lambda i: (0, 0)),
            ],
            out_specs=pl.BlockSpec((tile_h, f_pad), lambda i: (i, 0)),
        ),
        compiler_params=pltpu.CompilerParams(
            dimension_semantics=("parallel",),
            vmem_limit_bytes=vmem_limit_bytes),
    )(x_p, w_t, b2)

    # ---- stage 2: out = A @ H  (M x K tiling, bounded VMEM) ----------------
    n_rt = n_pad_m // tile_m
    n_ct = n_pad_k // tile_k

    if out_is_f32:
        agg_kernel = _agg_kernel_f32out      # accumulate into resident output
        scratch_shapes = []
    else:
        agg_kernel = _agg_kernel_scratch     # separate f32 accumulator
        scratch_shapes = [pltpu.VMEM((tile_m, f_pad), jnp.float32)]

    out = pl.pallas_call(
        agg_kernel,
        out_shape=jax.ShapeDtypeStruct((n_pad_m, f_pad), out_dtype),
        grid_spec=pltpu.PrefetchScalarGridSpec(
            num_scalar_prefetch=0,
            grid=(n_rt, n_ct),
            in_specs=[
                pl.BlockSpec((tile_m, tile_k), lambda i, k: (i, k)),
                pl.BlockSpec((tile_k, f_pad), lambda i, k: (k, 0)),
            ],
            out_specs=pl.BlockSpec((tile_m, f_pad), lambda i, k: (i, 0)),
            scratch_shapes=scratch_shapes,
        ),
        compiler_params=pltpu.CompilerParams(
            dimension_semantics=("parallel", "arbitrary"),
            vmem_limit_bytes=vmem_limit_bytes),
    )(a_p, h)

    return out[:N, :f_out]


if __name__ == "__main__":
    key = jax.random.PRNGKey(0)
    k_x, k_w, k_b, k_a, k_mask = jax.random.split(key, 5)

    # Small shapes consistent with the module: N nodes, input_size -> output_size
    N = 256
    input_size = 64
    output_size = 32

    # Node features
    x = jax.random.normal(k_x, (N, input_size), dtype=jnp.float32)

    # nn.Linear(input_size, output_size) parameters, deterministic init
    # (PyTorch default: uniform(-1/sqrt(fan_in), 1/sqrt(fan_in)))
    bound = 1.0 / (input_size ** 0.5)
    weight = jax.random.uniform(
        k_w, (output_size, input_size), minval=-bound, maxval=bound,
        dtype=jnp.float32)
    bias = jax.random.uniform(
        k_b, (output_size,), minval=-bound, maxval=bound, dtype=jnp.float32)

    # Weighted graph as dense adjacency: adj[dst, src] = edge weight (sparse)
    raw_w = jax.random.uniform(k_a, (N, N), dtype=jnp.float32)
    mask = (jax.random.uniform(k_mask, (N, N)) < 0.1).astype(jnp.float32)
    adj = raw_w * mask

    out = gcn_conv_dgl(x, adj, weight, bias)
    out = jax.block_until_ready(out)

    # Pure-JAX reference of the DGL semantics: out = A @ (x @ W.T + b)
    ref = adj @ (x @ weight.T + bias)
    assert out.shape == (N, output_size)
    assert jnp.allclose(out, ref, atol=1e-3, rtol=1e-3), "mismatch vs reference"

    print("KERNEL_OK")
</pallas_src>

<mosaic_0001>
module attributes {stable_mosaic.version = 11 : i64} {
  func.func @_linear_kernel(%arg0: i32, %arg1: memref<256x64xf32, #tpu.memory_space<vmem>>, %arg2: memref<64x128xf32, #tpu.memory_space<vmem>>, %arg3: memref<1x128xf32, #tpu.memory_space<vmem>>, %arg4: memref<256x128xf32, #tpu.memory_space<vmem>>) attributes {dimension_semantics = [#tpu.dimension_semantics<parallel>], iteration_bounds = array<i64: 1>, scalar_prefetch = 0 : i64, scratch_operands = 0 : i64, tpu.core_type = #tpu.core_type<tc>, window_params = [{transform_indices = @transform_0, window_bounds = array<i64: 256, 64>}, {pipeline_mode = #tpu.pipeline_mode<synchronous>, transform_indices = @transform_1, window_bounds = array<i64: 64, 128>}, {pipeline_mode = #tpu.pipeline_mode<synchronous>, transform_indices = @transform_2, window_bounds = array<i64: 1, 128>}, {transform_indices = @transform_3, window_bounds = array<i64: 256, 128>}]} {
    %c0 = arith.constant 0 : index
    %c0_0 = arith.constant 0 : index
    %0 = vector.load %arg1[%c0, %c0_0] : memref<256x64xf32, #tpu.memory_space<vmem>>, vector<256x64xf32>
    %c0_1 = arith.constant 0 : index
    %c0_2 = arith.constant 0 : index
    %1 = vector.load %arg2[%c0_1, %c0_2] : memref<64x128xf32, #tpu.memory_space<vmem>>, vector<64x128xf32>
    %cst = arith.constant dense<0.000000e+00> : vector<256x128xf32>
    %2 = tpu.matmul %0, %1, %cst {dimension_numbers = #tpu.dot_dimension_numbers<[1], [0], [0], [1], [0, 0, 1, 1], [], []>} : vector<256x64xf32>, vector<64x128xf32>, vector<256x128xf32> -> vector<256x128xf32>
    %c0_3 = arith.constant 0 : index
    %c0_4 = arith.constant 0 : index
    %3 = vector.load %arg3[%c0_3, %c0_4] : memref<1x128xf32, #tpu.memory_space<vmem>>, vector<1x128xf32>
    %4 = vector.broadcast %3 : vector<1x128xf32> to vector<256x128xf32>
    %5 = arith.addf %2, %4 : vector<256x128xf32>
    %c0_5 = arith.constant 0 : index
    %c0_6 = arith.constant 0 : index
    %6 = vector.load %arg4[%c0_5, %c0_6] : memref<256x128xf32, #tpu.memory_space<vmem>>, vector<256x128xf32>
    tpu.vector_store %arg4[%c0_5, %c0_6], %5 {strides = array<i32>} : memref<256x128xf32, #tpu.memory_space<vmem>>, vector<256x128xf32>,
    return
  }
  func.func @transform_0(%arg0: i32) -> (i32, i32) {
    %c0_i32 = arith.constant 0 : i32
    %c0_i32_0 = arith.constant 0 : i32
    return %arg0, %c0_i32 : i32, i32
  }
  func.func @transform_1(%arg0: i32) -> (i32, i32) {
    %c0_i32 = arith.constant 0 : i32
    %c0_i32_0 = arith.constant 0 : i32
    %c0_i32_1 = arith.constant 0 : i32
    return %c0_i32, %c0_i32_0 : i32, i32
  }
  func.func @transform_2(%arg0: i32) -> (i32, i32) {
    %c0_i32 = arith.constant 0 : i32
    %c0_i32_0 = arith.constant 0 : i32
    %c0_i32_1 = arith.constant 0 : i32
    return %c0_i32, %c0_i32_0 : i32, i32
  }
  func.func @transform_3(%arg0: i32) -> (i32, i32) {
    %c0_i32 = arith.constant 0 : i32
    %c0_i32_0 = arith.constant 0 : i32
    return %arg0, %c0_i32 : i32, i32
  }
}

</mosaic_0001>

<bundles_post_ra>
// kernel: tpu_custom_call.1
= control target key start
LH: loop header
LB: loop body
LE: loop exit
PB: predicated region body
PF: predicated region fallthrough
CT: control target
= control target key end

     0   :  { %vm62_vm0 = vcmask 523264   ;;  %s844_s0 = inlined_call_operand.vmem [shape: f32[256,64], index: 0, kind: input, shape index: {}]   ;;  %s845_s1 = inlined_call_operand.vmem [shape: f32[64,128], index: 1, kind: input, shape index: {}]   ;;  %s846_s2 = inlined_call_operand.vmem [shape: f32[1,128], index: 2, kind: input, shape index: {}]   ;;  %s847_s3 = inlined_call_operand.hbm [shape: f32[256,128], index: 3, kind: output, shape index: {}]  }
   0x1   :  { %v47_v0 = vld [vmem:[%s845_s1] sm:$0xff]  ;;  %v48_v1 = vld [vmem:[%s845_s1 + $0x8] sm:$0xff]  ;;  %v49_v2 = vld [vmem:[%s845_s1 + $0x10] sm:$0xff] }
   0x2   :  { %v569_v3 = vpack.c.bf16 %v48_v1, %v47_v0  ;;  %v50_v4 = vld [vmem:[%s845_s1 + $0x18] sm:$0xff]  ;;  %v51_v6 = vld [vmem:[%s845_s1 + $0x20] sm:$0xff]  ;;  %v52_v7 = vld [vmem:[%s845_s1 + $0x28] sm:$0xff] }
   0x3   :  { %v573_v5 = vpack.c.bf16 %v50_v4, %v49_v2  ;;  %v15_v8 = vld [vmem:[%s844_s0] sm:$0xff]  ;;  %v577_v10 = vpack.c.bf16 %v52_v7, %v51_v6  ;;  %v53_v11 = vld [vmem:[%s845_s1 + $0x30] sm:$0xff]  ;;  %v54_v12 = vld [vmem:[%s845_s1 + $0x38] sm:$0xff] }
   0x4   :  { %570 = vmatprep.subr.bf16.mxu0 %v569_v3  ;;  %585 = vmatprep.subr.bf16.mxu1 %v569_v3  ;;  %v31_v9 = vld [vmem:[%s844_s0 + $0x80] sm:$0xff]  ;;  %v581_v13 = vpack.c.bf16 %v54_v12, %v53_v11 }
   0x5   :  { %572 = vmatpush3.bf16.msra.mxu0 %v569_v3  ;;  %589 = vmatpush3.bf16.msra.mxu1 %v569_v3 }
   0x6   :  { %574 = vmatprep.subr.bf16.mxu0 %v573_v5  ;;  %586 = vmatprep.subr.bf16.mxu1 %v573_v5 }
   0x7   :  { %521 = vmatprep.mubr.msk.f32.mxu0 %vm62_vm0, %v15_v8  ;;  %545 = vmatprep.mubr.msk.f32.mxu1 %vm62_vm0, %v31_v9 }
   0x9   :  { %576 = vmatpush3.bf16.msra.mxu0 %v573_v5  ;;  %590 = vmatpush3.bf16.msra.mxu1 %v573_v5 }
   0xa   :  { %578 = vmatprep.subr.bf16.mxu0 %v577_v10  ;;  %587 = vmatprep.subr.bf16.mxu1 %v577_v10 }
   0xd   :  { %580 = vmatpush3.bf16.msra.mxu0 %v577_v10  ;;  %591 = vmatpush3.bf16.msra.mxu1 %v577_v10 }
   0xe   :  { %582 = vmatprep.subr.bf16.mxu0 %v581_v13  ;;  %588 = vmatprep.subr.bf16.mxu1 %v581_v13 }
   0xf   :  { %8 = vsyncpa [#allocation3], 0  ;;  %v16_v14 = vld [vmem:[%s844_s0 + $0x8] sm:$0xff]  ;;  %v17_v16 = vld [vmem:[%s844_s0 + $0x10] sm:$0xff] }
  0x10   :  { %v32_v15 = vld [vmem:[%s844_s0 + $0x88] sm:$0xff]  ;;  %v33_v17 = vld [vmem:[%s844_s0 + $0x90] sm:$0xff]  ;;  %v18_v18 = vld [vmem:[%s844_s0 + $0x18] sm:$0xff] }
  0x11   :  { %584 = vmatpush3.bf16.msra.mxu0 %v581_v13  ;;  %592 = vmatpush3.bf16.msra.mxu1 %v581_v13  ;;  %v34_v19 = vld [vmem:[%s844_s0 + $0x98] sm:$0xff]  ;;  %v19_v20 = vld [vmem:[%s844_s0 + $0x20] sm:$0xff]  ;;  %v20_v22 = vld [vmem:[%s844_s0 + $0x28] sm:$0xff] }
  0x12   :  { %v35_v21 = vld [vmem:[%s844_s0 + $0xa0] sm:$0xff]  ;;  %v36_v23 = vld [vmem:[%s844_s0 + $0xa8] sm:$0xff]  ;;  %v21_v24 = vld [vmem:[%s844_s0 + $0x30] sm:$0xff] }
  0x13   :  { %v37_v25 = vld [vmem:[%s844_s0 + $0xb0] sm:$0xff]  ;;  %v22_v26 = vld [vmem:[%s844_s0 + $0x38] sm:$0xff]  ;;  %v23_v28 = vld [vmem:[%s844_s0 + $0x40] sm:$0xff] }
  0x14   :  { %522 = vmatmul.mubr.msk.f32.vlgmr.msra.gmra.mrb[0].mxu0 %vm62_vm0, %v16_v14  ;;  %546 = vmatmul.mubr.msk.f32.vlgmr.msra.gmra.mrb[0].mxu1 %vm62_vm0, %v32_v15  ;;  %v38_v27 = vld [vmem:[%s844_s0 + $0xb8] sm:$0xff]  ;;  %v39_v29 = vld [vmem:[%s844_s0 + $0xc0] sm:$0xff]  ;;  %v24_v30 = vld [vmem:[%s844_s0 + $0x48] sm:$0xff] }
  0x15   :  { %524 = vmatprep.mubr.msk.f32.mxu0 %vm62_vm0, %v17_v16  ;;  %548 = vmatprep.mubr.msk.f32.mxu1 %vm62_vm0, %v33_v17  ;;  %v40_v31 = vld [vmem:[%s844_s0 + $0xc8] sm:$0xff]  ;;  %v25_v32 = vld [vmem:[%s844_s0 + $0x50] sm:$0xff]  ;;  %v26_v34 = vld [vmem:[%s844_s0 + $0x58] sm:$0xff] }
  0x16   :  { %v41_v33 = vld [vmem:[%s844_s0 + $0xd0] sm:$0xff]  ;;  %v42_v35 = vld [vmem:[%s844_s0 + $0xd8] sm:$0xff]  ;;  %v27_v36 = vld [vmem:[%s844_s0 + $0x60] sm:$0xff] }
  0x17   :  { %v43_v37 = vld [vmem:[%s844_s0 + $0xe0] sm:$0xff]  ;;  %v28_v38 = vld [vmem:[%s844_s0 + $0x68] sm:$0xff]  ;;  %v29_v40 = vld [vmem:[%s844_s0 + $0x70] sm:$0xff] }
  0x18   :  { %525 = vmatmul.mubr.msk.f32.gmra.mrb[2].mxu0 %vm62_vm0, %v18_v18  ;;  %549 = vmatmul.mubr.msk.f32.gmra.mrb[2].mxu1 %vm62_vm0, %v34_v19  ;;  %v44_v39 = vld [vmem:[%s844_s0 + $0xe8] sm:$0xff]  ;;  %v45_v41 = vld [vmem:[%s844_s0 + $0xf0] sm:$0xff]  ;;  %v30_v42 = vld [vmem:[%s844_s0 + $0x78] sm:$0xff] }
  0x19   :  { %527 = vmatprep.mubr.msk.f32.mxu0 %vm62_vm0, %v19_v20  ;;  %551 = vmatprep.mubr.msk.f32.mxu1 %vm62_vm0, %v35_v21  ;;  %v46_v43 = vld [vmem:[%s844_s0 + $0xf8] sm:$0xff]  ;;  %v798_v44 = vld [vmem:[%s846_s2] ss:$0 sm:$0xff]  ;;  %s620_s0 = smov [#allocation2]  }
  0x1a   :  { %s421_s2 = sshll.u32 %s620_s0, 4  ;;  %s422_s2 = int_to_ptr.vmem [resolvable:$true] %s421_s2 }
  0x1b   :  { %s596_s10 = scalar_lea.vmem %s422_s2, 4096  ;;  %p601_p1 = scmp.lt.s32.totalorder %s422_s2, %s422_s2 }
  0x1c   :  { %528 = vmatmul.mubr.msk.f32.gmra.mrb[4].mxu0 %vm62_vm0, %v20_v22  ;;  %552 = vmatmul.mubr.msk.f32.gmra.mrb[4].mxu1 %vm62_vm0, %v36_v23  ;;  %p597_p0 = scmp.ne.s32.totalorder %s422_s2, %s596_s10  ;;  %p602_p2 = scmp.lt.s32.totalorder %s596_s10, %s596_s10 }
  0x1d   :  { %530 = vmatprep.mubr.msk.f32.mxu0 %vm62_vm0, %v21_v24  ;;  %554 = vmatprep.mubr.msk.f32.mxu1 %vm62_vm0, %v37_v25 }
  0x1e   :  { %p603_p3 = por %p602_p2, %p601_p1 }
  0x20   :  { %531 = vmatmul.mubr.msk.f32.gmra.mrb[6].mxu0 %vm62_vm0, %v22_v26  ;;  %555 = vmatmul.mubr.msk.f32.gmra.mrb[6].mxu1 %vm62_vm0, %v38_v27  ;;  %p604_p4 = pnand %p603_p3, %p597_p0 }
  0x21   :  { %533 = vmatprep.mubr.msk.f32.mxu0 %vm62_vm0, %v23_v28  ;;  %557 = vmatprep.mubr.msk.f32.mxu1 %vm62_vm0, %v39_v29 }
  0x24   :  { %534 = vmatmul.mubr.msk.f32.gmra.mrb[8].mxu0 %vm62_vm0, %v24_v30  ;;  %558 = vmatmul.mubr.msk.f32.gmra.mrb[8].mxu1 %vm62_vm0, %v40_v31 }
  0x25   :  { %536 = vmatprep.mubr.msk.f32.mxu0 %vm62_vm0, %v25_v32  ;;  %560 = vmatprep.mubr.msk.f32.mxu1 %vm62_vm0, %v41_v33 }
  0x28   :  { %537 = vmatmul.mubr.msk.f32.gmra.mrb[10].mxu0 %vm62_vm0, %v26_v34  ;;  %561 = vmatmul.mubr.msk.f32.gmra.mrb[10].mxu1 %vm62_vm0, %v42_v35 }
  0x29   :  { %539 = vmatprep.mubr.msk.f32.mxu0 %vm62_vm0, %v27_v36  ;;  %563 = vmatprep.mubr.msk.f32.mxu1 %vm62_vm0, %v43_v37 }
  0x2c   :  { %540 = vmatmul.mubr.msk.f32.gmra.mrb[12].mxu0 %vm62_vm0, %v28_v38  ;;  %564 = vmatmul.mubr.msk.f32.gmra.mrb[12].mxu1 %vm62_vm0, %v44_v39 }
  0x2d   :  { %542 = vmatprep.mubr.msk.f32.mxu0 %vm62_vm0, %v29_v40  ;;  %566 = vmatprep.mubr.msk.f32.mxu1 %vm62_vm0, %v45_v41 }
  0x30   :  { %543 = vmatmul.mubr.msk.f32.gmra.mrb[14].mxu0 %vm62_vm0, %v30_v42  ;;  %567 = vmatmul.mubr.msk.f32.gmra.mrb[14].mxu1 %vm62_vm0, %v46_v43 }
  0xe7   :  { %v523_v45 = vpop.f32.mrb[0].mxu0  ;;  %v547_v46 = vpop.f32.mrb[0].mxu1 }
  0xe8   :  { %v231_v47 = vadd.f32 %v523_v45, %v798_v44  ;;  %v311_v48 = vadd.f32 %v547_v46, %v798_v44  ;;  %v225_v49 = vpop.f32.mrb[1].mxu0  ;;  %v305_v50 = vpop.f32.mrb[1].mxu1 }
  0xe9   :  { %v226_v51 = vadd.f32 %v798_v44, %v225_v49  ;;  %v306_v52 = vadd.f32 %v798_v44, %v305_v50 }
  0xea   :  { %385 = vst [vmem:[#allocation2 + $0x8] sm:$0xff] %v231_v47  ;;  %401 = vst [vmem:[#allocation2 + $0x88] sm:$0xff] %v311_v48 }
  0xeb   :  { %384 = vst [vmem:[#allocation2] sm:$0xff] %v226_v51  ;;  %400 = vst [vmem:[#allocation2 + $0x80] sm:$0xff] %v306_v52  ;;  %v526_v53 = vpop.f32.mrb[2].mxu0  ;;  %v550_v54 = vpop.f32.mrb[2].mxu1 }
  0xec   :  { %v241_v55 = vadd.f32 %v526_v53, %v798_v44  ;;  %v321_v56 = vadd.f32 %v550_v54, %v798_v44  ;;  %v235_v57 = vpop.f32.mrb[3].mxu0  ;;  %v315_v58 = vpop.f32.mrb[3].mxu1 }
  0xed   :  { %v236_v59 = vadd.f32 %v798_v44, %v235_v57  ;;  %v316_v60 = vadd.f32 %v798_v44, %v315_v58 }
  0xee   :  { %387 = vst [vmem:[#allocation2 + $0x18] sm:$0xff] %v241_v55  ;;  %403 = vst [vmem:[#allocation2 + $0x98] sm:$0xff] %v321_v56 }
  0xef   :  { %386 = vst [vmem:[#allocation2 + $0x10] sm:$0xff] %v236_v59  ;;  %402 = vst [vmem:[#allocation2 + $0x90] sm:$0xff] %v316_v60  ;;  %v529_v61 = vpop.f32.mrb[4].mxu0  ;;  %v553_v62 = vpop.f32.mrb[4].mxu1 }
  0xf0   :  { %v251_v63 = vadd.f32 %v529_v61, %v798_v44  ;;  %v331_v0 = vadd.f32 %v553_v62, %v798_v44  ;;  %v245_v1 = vpop.f32.mrb[5].mxu0  ;;  %v325_v2 = vpop.f32.mrb[5].mxu1 }
  0xf1   :  { %v246_v3 = vadd.f32 %v798_v44, %v245_v1  ;;  %v326_v4 = vadd.f32 %v798_v44, %v325_v2 }
  0xf2   :  { %389 = vst [vmem:[#allocation2 + $0x28] sm:$0xff] %v251_v63  ;;  %405 = vst [vmem:[#allocation2 + $0xa8] sm:$0xff] %v331_v0 }
  0xf3   :  { %388 = vst [vmem:[#allocation2 + $0x20] sm:$0xff] %v246_v3  ;;  %404 = vst [vmem:[#allocation2 + $0xa0] sm:$0xff] %v326_v4  ;;  %v532_v5 = vpop.f32.mrb[6].mxu0  ;;  %v556_v6 = vpop.f32.mrb[6].mxu1 }
  0xf4   :  { %v261_v7 = vadd.f32 %v532_v5, %v798_v44  ;;  %v341_v8 = vadd.f32 %v556_v6, %v798_v44  ;;  %v255_v9 = vpop.f32.mrb[7].mxu0  ;;  %v335_v10 = vpop.f32.mrb[7].mxu1 }
  0xf5   :  { %v256_v11 = vadd.f32 %v798_v44, %v255_v9  ;;  %v336_v12 = vadd.f32 %v798_v44, %v335_v10 }
  0xf6   :  { %391 = vst [vmem:[#allocation2 + $0x38] sm:$0xff] %v261_v7  ;;  %407 = vst [vmem:[#allocation2 + $0xb8] sm:$0xff] %v341_v8 }
  0xf7   :  { %390 = vst [vmem:[#allocation2 + $0x30] sm:$0xff] %v256_v11  ;;  %406 = vst [vmem:[#allocation2 + $0xb0] sm:$0xff] %v336_v12  ;;  %v535_v13 = vpop.f32.mrb[8].mxu0  ;;  %v559_v14 = vpop.f32.mrb[8].mxu1 }
  0xf8   :  { %v271_v15 = vadd.f32 %v535_v13, %v798_v44  ;;  %v351_v16 = vadd.f32 %v559_v14, %v798_v44  ;;  %v265_v17 = vpop.f32.mrb[9].mxu0  ;;  %v345_v18 = vpop.f32.mrb[9].mxu1 }
  0xf9   :  { %v266_v19 = vadd.f32 %v798_v44, %v265_v17  ;;  %v346_v20 = vadd.f32 %v798_v44, %v345_v18 }
  0xfa   :  { %393 = vst [vmem:[#allocation2 + $0x48] sm:$0xff] %v271_v15  ;;  %409 = vst [vmem:[#allocation2 + $0xc8] sm:$0xff] %v351_v16 }
  0xfb   :  { %392 = vst [vmem:[#allocation2 + $0x40] sm:$0xff] %v266_v19  ;;  %408 = vst [vmem:[#allocation2 + $0xc0] sm:$0xff] %v346_v20  ;;  %v538_v21 = vpop.f32.mrb[10].mxu0  ;;  %v562_v22 = vpop.f32.mrb[10].mxu1 }
  0xfc   :  { %v281_v23 = vadd.f32 %v538_v21, %v798_v44  ;;  %v361_v24 = vadd.f32 %v562_v22, %v798_v44  ;;  %v275_v25 = vpop.f32.mrb[11].mxu0  ;;  %v355_v26 = vpop.f32.mrb[11].mxu1 }
  0xfd   :  { %v276_v27 = vadd.f32 %v798_v44, %v275_v25  ;;  %v356_v28 = vadd.f32 %v798_v44, %v355_v26 }
  0xfe   :  { %395 = vst [vmem:[#allocation2 + $0x58] sm:$0xff] %v281_v23  ;;  %411 = vst [vmem:[#allocation2 + $0xd8] sm:$0xff] %v361_v24 }
  0xff   :  { %394 = vst [vmem:[#allocation2 + $0x50] sm:$0xff] %v276_v27  ;;  %410 = vst [vmem:[#allocation2 + $0xd0] sm:$0xff] %v356_v28  ;;  %v541_v29 = vpop.f32.mrb[12].mxu0  ;;  %v565_v30 = vpop.f32.mrb[12].mxu1 }
 0x100   :  { %v291_v31 = vadd.f32 %v541_v29, %v798_v44  ;;  %v371_v32 = vadd.f32 %v565_v30, %v798_v44  ;;  %v285_v33 = vpop.f32.mrb[13].mxu0  ;;  %v365_v34 = vpop.f32.mrb[13].mxu1 }
 0x101   :  { %v286_v35 = vadd.f32 %v798_v44, %v285_v33  ;;  %v366_v36 = vadd.f32 %v798_v44, %v365_v34 }
 0x102   :  { %397 = vst [vmem:[#allocation2 + $0x68] sm:$0xff] %v291_v31  ;;  %413 = vst [vmem:[#allocation2 + $0xe8] sm:$0xff] %v371_v32 }
 0x103   :  { %396 = vst [vmem:[#allocation2 + $0x60] sm:$0xff] %v286_v35  ;;  %412 = vst [vmem:[#allocation2 + $0xe0] sm:$0xff] %v366_v36  ;;  %v544_v37 = vpop.f32.mrb[14].mxu0  ;;  %v568_v38 = vpop.f32.mrb[14].mxu1 }
 0x104   :  { %v301_v39 = vadd.f32 %v544_v37, %v798_v44  ;;  %v381_v40 = vadd.f32 %v568_v38, %v798_v44  ;;  %v295_v41 = vpop.f32.mrb[15].mxu0  ;;  %v375_v42 = vpop.f32.mrb[15].mxu1 }
 0x105   :  { %v296_v43 = vadd.f32 %v798_v44, %v295_v41  ;;  %v376_v45 = vadd.f32 %v798_v44, %v375_v42 }
 0x106   :  { %399 = vst [vmem:[#allocation2 + $0x78] sm:$0xff] %v301_v39  ;;  %415 = vst [vmem:[#allocation2 + $0xf8] sm:$0xff] %v381_v40 }
 0x107   :  { %398 = vst [vmem:[#allocation2 + $0x70] sm:$0xff] %v296_v43  ;;  %414 = vst [vmem:[#allocation2 + $0xf0] sm:$0xff] %v376_v45 }
 0x108   :  { %607 = shalt.err (!%p604_p4)
}
 0x109   :  { %s608_s13 = scalar_lea.hbm %s847_s3, 4096 }
 0x10a   :  { %p609_p5 = scmp.ne.s32.totalorder %s847_s3, %s608_s13  ;;  %p612_p6 = scmp.lt.u32.totalorder %s608_s13, %s847_s3 }
 0x10c   :  { %p614_p7 = pnand %p612_p6, %p609_p5 }
 0x10e   :  { %617 = shalt.err (!%p614_p7)
}
 0x10f   :  { %s621_s18 = smov 128   ;;  %s622_s19 = smov 8  }
 0x110   :  { %427 = dma.vmem_to_hbm [thread:$0]  %s422_s2, 4096, %s847_s3, [#allocation3], %s621_s18, %s621_s18, %s622_s19  }
 0x111   :  { %618 = dma.done.wait [#allocation3], 4096  }
 0x112   :  { %619 = vsyncadd [#allocation3], 4294963200 }
 0x113   :  { %431 = vsyncpa [#allocation3], 1 }

</bundles_post_ra>
